<compile_context>
chip_gen: v6e
topology: v6e:2x2x1
jax: 0.10.0
libtpu: 0.0.40
codegen_flags: <defaults>
</compile_context>

<pallas_src>
import functools
import math

import jax
import jax.numpy as jnp
from jax.experimental import pallas as pl
from jax.experimental.pallas import tpu as pltpu


# ----------------------------------------------------------------------------
# helpers
# ----------------------------------------------------------------------------

def _choose_tile(dim, preferred, multiple):
    """Largest tile <= preferred that is a multiple of `multiple` and divides
    `dim`; falls back to the full dimension (always a legal block)."""
    if dim <= preferred:
        return dim
    t = (preferred // multiple) * multiple
    while t >= multiple:
        if dim % t == 0:
            return t
        t -= multiple
    return dim


# ----------------------------------------------------------------------------
# Tiled linear kernel: y = x @ W + b   (W stored as [in, out])
# ----------------------------------------------------------------------------

def _linear_kernel(x_ref, w_ref, b_ref, o_ref, acc_ref):
    k = pl.program_id(2)

    @pl.when(k == 0)
    def _init():
        acc_ref[...] = jnp.zeros_like(acc_ref)

    # bf16 MXU operands, f32 accumulation.
    acc_ref[...] += jnp.dot(
        x_ref[...].astype(jnp.bfloat16),
        w_ref[...].astype(jnp.bfloat16),
        preferred_element_type=jnp.float32,
    )

    @pl.when(k == pl.num_programs(2) - 1)
    def _finalize():
        y = acc_ref[...] + b_ref[...].astype(jnp.float32)
        o_ref[...] = y.astype(o_ref.dtype)


def linear(x, w, b, *, tm_pref=256, tn_pref=512, tk_pref=512):
    M, K = x.shape
    Kw, N = w.shape
    assert K == Kw
    # Tile sizes chosen to stay well under the 32 MiB default scoped VMEM
    # (fits v5e/v6e/v7x) while keeping lane-dense blocks.
    tm = _choose_tile(M, tm_pref, 8)
    tn = _choose_tile(N, tn_pref, 128)
    tk = _choose_tile(K, tk_pref, 128)
    grid = (M // tm, N // tn, K // tk)

    return pl.pallas_call(
        _linear_kernel,
        out_shape=jax.ShapeDtypeStruct((M, N), x.dtype),
        grid_spec=pltpu.PrefetchScalarGridSpec(
            num_scalar_prefetch=0,
            grid=grid,
            in_specs=[
                pl.BlockSpec((tm, tk), lambda i, j, k: (i, k)),
                pl.BlockSpec((tk, tn), lambda i, j, k: (k, j)),
                pl.BlockSpec((1, tn), lambda i, j, k: (0, j)),
            ],
            out_specs=pl.BlockSpec((tm, tn), lambda i, j, k: (i, j)),
            scratch_shapes=[pltpu.VMEM((tm, tn), jnp.float32)],
        ),
        compiler_params=pltpu.CompilerParams(
            dimension_semantics=("parallel", "parallel", "arbitrary")),
    )(x, w, b.reshape(1, N))


# ----------------------------------------------------------------------------
# Flash-style causal attention over the fused QKV buffer
# ----------------------------------------------------------------------------

def _flash_attn_kernel(qkv_q_ref, qkv_kv_ref, o_ref, m_sc, l_sc, acc_sc,
                       *, n_head, head_dim, n_embd, scale):
    H, D, C = n_head, head_dim, n_embd
    qi = pl.program_id(1)
    ki = pl.program_id(2)
    nk = pl.num_programs(2)
    tq = o_ref.shape[0]
    tk = qkv_kv_ref.shape[0]

    @pl.when(ki == 0)
    def _init():
        m_sc[...] = jnp.full(m_sc.shape, -1e30, dtype=m_sc.dtype)
        l_sc[...] = jnp.zeros_like(l_sc)
        acc_sc[...] = jnp.zeros_like(acc_sc)

    q_start = qi * tq
    kv_start = ki * tk

    # Causal block skipping: only compute when this KV tile intersects the
    # lower-triangular region for this Q tile.
    @pl.when(kv_start <= q_start + tq - 1)
    def _compute():
        # q/k/v are static lane slices of the fused (t, 3C) QKV tiles.
        q = qkv_q_ref[:, 0:C].astype(jnp.float32) * scale          # (tq, C)
        k = qkv_kv_ref[:, C:2 * C]                                  # (tk, C)
        v = qkv_kv_ref[:, 2 * C:3 * C]                              # (tk, C)

        qh = q.reshape(tq, H, D).astype(jnp.bfloat16)
        kh = k.reshape(tk, H, D).astype(jnp.bfloat16)
        vh = v.reshape(tk, H, D).astype(jnp.bfloat16)

        # scores: (H, tq, tk), bf16 MXU inputs, f32 accumulation.
        s = jnp.einsum('qhd,khd->hqk', qh, kh,
                       preferred_element_type=jnp.float32)

        # Causal mask from O(tq)+O(tk) iotas (no full (T,T) int temporaries).
        row = q_start + jax.lax.broadcasted_iota(jnp.int32, (tq, 1), 0)
        col = kv_start + jax.lax.broadcasted_iota(jnp.int32, (1, tk), 1)
        mask = col <= row                                           # (tq, tk)
        s = jnp.where(mask[None, :, :], s, -1e30)

        # Online softmax update.
        m_prev = m_sc[...]                                          # (H, tq, 1)
        m_new = jnp.maximum(m_prev, s.max(axis=-1, keepdims=True))
        alpha = jnp.exp(m_prev - m_new)
        p = jnp.exp(s - m_new)                                      # (H, tq, tk)
        l_sc[...] = alpha * l_sc[...] + p.sum(axis=-1, keepdims=True)
        pv = jnp.einsum('hqk,khd->hqd', p.astype(jnp.bfloat16), vh,
                        preferred_element_type=jnp.float32)         # (H, tq, D)
        acc_sc[...] = alpha * acc_sc[...] + pv
        m_sc[...] = m_new

    @pl.when(ki == nk - 1)
    def _finalize():
        inv_l = pl.reciprocal(l_sc[...], approx=True)               # (H, tq, 1)
        out = acc_sc[...] * inv_l                                   # (H, tq, D)
        out = out.transpose(1, 0, 2).reshape(tq, H * D)             # (tq, C) lane-dense
        o_ref[...] = out.astype(o_ref.dtype)


def flash_causal_attention(qkv, *, batch, seq_len, n_head, out_dtype,
                           tq_pref=128, tk_pref=128):
    """qkv: (B*T, 3C) fused projection. Returns (B*T, C) merged-head output."""
    BT, C3 = qkv.shape
    assert BT == batch * seq_len
    C = C3 // 3
    D = C // n_head
    scale = 1.0 / math.sqrt(D)

    tq = _choose_tile(seq_len, tq_pref, 8)
    tk = _choose_tile(seq_len, tk_pref, 8)
    nq, nk = seq_len // tq, seq_len // tk
    grid = (batch, nq, nk)

    kernel = functools.partial(_flash_attn_kernel, n_head=n_head,
                               head_dim=D, n_embd=C, scale=scale)

    return pl.pallas_call(
        kernel,
        out_shape=jax.ShapeDtypeStruct((BT, C), out_dtype),
        grid_spec=pltpu.PrefetchScalarGridSpec(
            num_scalar_prefetch=0,
            grid=grid,
            in_specs=[
                # Q stream: rows of this batch's Q tile (full fused 3C lanes).
                pl.BlockSpec((tq, C3), lambda b, qi, ki: (b * nq + qi, 0)),
                # KV stream: rows of this batch's KV tile.
                pl.BlockSpec((tk, C3), lambda b, qi, ki: (b * nk + ki, 0)),
            ],
            out_specs=pl.BlockSpec((tq, C), lambda b, qi, ki: (b * nq + qi, 0)),
            scratch_shapes=[
                pltpu.VMEM((n_head, tq, 1), jnp.float32),   # running max m
                pltpu.VMEM((n_head, tq, 1), jnp.float32),   # running sum l
                pltpu.VMEM((n_head, tq, D), jnp.float32),   # output accumulator
            ],
        ),
        compiler_params=pltpu.CompilerParams(
            dimension_semantics=("parallel", "parallel", "arbitrary")),
    )(qkv, qkv)


# ----------------------------------------------------------------------------
# Module forward: CausalSelfAttention
# ----------------------------------------------------------------------------

def causal_self_attention(x, params, n_head):
    """x: (B, T, C). params weights stored as [in, out] (torch weight.T)."""
    B, T, C = x.shape
    x2 = x.reshape(B * T, C)
    qkv = linear(x2, params["attn_w"], params["attn_b"])           # (B*T, 3C)
    y = flash_causal_attention(qkv, batch=B, seq_len=T, n_head=n_head,
                               out_dtype=x.dtype)                  # (B*T, C)
    y = linear(y, params["proj_w"], params["proj_b"])              # (B*T, C)
    return y.reshape(B, T, C)


def init_params(key, n_embd):
    C = n_embd
    ks = jax.random.split(key, 4)

    def nrm(k, shape, std=0.02):
        return (std * jax.random.normal(k, shape)).astype(jnp.float32)

    return {
        "attn_w": nrm(ks[0], (C, 3 * C)),
        "attn_b": nrm(ks[1], (3 * C,)),
        "proj_w": nrm(ks[2], (C, C)),
        "proj_b": nrm(ks[3], (C,)),
    }


def reference_attention(x, params, n_head):
    """Pure-JAX f32 reference matching the PyTorch module."""
    B, T, C = x.shape
    D = C // n_head
    qkv = x.reshape(B * T, C) @ params["attn_w"] + params["attn_b"]
    qkv = qkv.reshape(B, T, 3 * C)
    q, k, v = jnp.split(qkv, 3, axis=-1)

    def heads(t):
        return t.reshape(B, T, n_head, D).transpose(0, 2, 1, 3)

    q, k, v = heads(q), heads(k), heads(v)
    att = jnp.einsum('bhqd,bhkd->bhqk', q, k) * (1.0 / math.sqrt(D))
    mask = jnp.tril(jnp.ones((T, T), dtype=bool))
    att = jnp.where(mask[None, None], att, -jnp.inf)
    att = jax.nn.softmax(att, axis=-1)
    y = jnp.einsum('bhqk,bhkd->bhqd', att, v)
    y = y.transpose(0, 2, 1, 3).reshape(B * T, C)
    y = y @ params["proj_w"] + params["proj_b"]
    return y.reshape(B, T, C)


# ----------------------------------------------------------------------------
# Main
# ----------------------------------------------------------------------------

if __name__ == "__main__":
    n_embd, n_head = 32, 2
    B, T = 2, 8

    key = jax.random.PRNGKey(0)
    pkey, xkey = jax.random.split(key)
    params = init_params(pkey, n_embd)
    x = (0.1 * jax.random.normal(xkey, (B, T, n_embd))).astype(jnp.float32)

    y = causal_self_attention(x, params, n_head)
    y = jax.block_until_ready(y)

    assert y.shape == (B, T, n_embd)
    assert bool(jnp.all(jnp.isfinite(y)))

    # bf16 MXU inputs + approx reciprocal => loose tolerance vs f32 reference.
    y_ref = reference_attention(x, params, n_head)
    assert bool(jnp.allclose(y, y_ref, rtol=5e-2, atol=1e-3)), "mismatch vs reference"

    print("KERNEL_OK")
</pallas_src>

<mosaic_0001>
module attributes {stable_mosaic.version = 11 : i64} {
  func.func @_linear_kernel(%arg0: i32, %arg1: i32, %arg2: i32, %arg3: memref<16x32xf32, #tpu.memory_space<vmem>>, %arg4: memref<32x96xf32, #tpu.memory_space<vmem>>, %arg5: memref<1x96xf32, #tpu.memory_space<vmem>>, %arg6: memref<16x96xf32, #tpu.memory_space<vmem>>, %arg7: memref<16x96xf32, #tpu.memory_space<vmem>>) attributes {dimension_semantics = [#tpu.dimension_semantics<parallel>, #tpu.dimension_semantics<parallel>, #tpu.dimension_semantics<arbitrary>], iteration_bounds = array<i64: 1, 1, 1>, scalar_prefetch = 0 : i64, scratch_operands = 1 : i64, tpu.core_type = #tpu.core_type<tc>, window_params = [{transform_indices = @transform_0, window_bounds = array<i64: 16, 32>}, {transform_indices = @transform_1, window_bounds = array<i64: 32, 96>}, {transform_indices = @transform_2, window_bounds = array<i64: 1, 96>}, {transform_indices = @transform_3, window_bounds = array<i64: 16, 96>}]} {
    %c0_i32 = arith.constant 0 : i32
    %0 = arith.cmpi eq, %arg2, %c0_i32 : i32
    %1 = arith.extui %0 : i1 to i32
    %c0_i32_0 = arith.constant 0 : i32
    %2 = arith.cmpi ne, %1, %c0_i32_0 : i32
    scf.if %2 {
      %cst_10 = arith.constant 0.000000e+00 : f32
      %14 = vector.broadcast %cst_10 : f32 to vector<16x96xf32>
      %c0_11 = arith.constant 0 : index
      %c0_12 = arith.constant 0 : index
      %15 = vector.load %arg7[%c0_11, %c0_12] : memref<16x96xf32, #tpu.memory_space<vmem>>, vector<16x96xf32>
      tpu.vector_store %arg7[%c0_11, %c0_12], %14 {strides = array<i32>} : memref<16x96xf32, #tpu.memory_space<vmem>>, vector<16x96xf32>,
    } else {
    }
    %c0 = arith.constant 0 : index
    %c0_1 = arith.constant 0 : index
    %3 = vector.load %arg7[%c0, %c0_1] : memref<16x96xf32, #tpu.memory_space<vmem>>, vector<16x96xf32>
    %c0_2 = arith.constant 0 : index
    %c0_3 = arith.constant 0 : index
    %4 = vector.load %arg3[%c0_2, %c0_3] : memref<16x32xf32, #tpu.memory_space<vmem>>, vector<16x32xf32>
    %5 = arith.truncf %4 : vector<16x32xf32> to vector<16x32xbf16>
    %c0_4 = arith.constant 0 : index
    %c0_5 = arith.constant 0 : index
    %6 = vector.load %arg4[%c0_4, %c0_5] : memref<32x96xf32, #tpu.memory_space<vmem>>, vector<32x96xf32>
    %7 = arith.truncf %6 : vector<32x96xf32> to vector<32x96xbf16>
    %cst = arith.constant dense<0.000000e+00> : vector<16x96xf32>
    %8 = tpu.matmul %5, %7, %cst {dimension_numbers = #tpu.dot_dimension_numbers<[1], [0], [0], [1], [0, 0, 1, 1], [], []>} : vector<16x32xbf16>, vector<32x96xbf16>, vector<16x96xf32> -> vector<16x96xf32>
    %9 = arith.addf %3, %8 : vector<16x96xf32>
    %c0_6 = arith.constant 0 : index
    %c0_7 = arith.constant 0 : index
    %10 = vector.load %arg7[%c0_6, %c0_7] : memref<16x96xf32, #tpu.memory_space<vmem>>, vector<16x96xf32>
    tpu.vector_store %arg7[%c0_6, %c0_7], %9 {strides = array<i32>} : memref<16x96xf32, #tpu.memory_space<vmem>>, vector<16x96xf32>,
    %c0_i32_8 = arith.constant 0 : i32
    %11 = arith.cmpi eq, %arg2, %c0_i32_8 : i32
    %12 = arith.extui %11 : i1 to i32
    %c0_i32_9 = arith.constant 0 : i32
    %13 = arith.cmpi ne, %12, %c0_i32_9 : i32
    scf.if %13 {
      %c0_10 = arith.constant 0 : index
      %c0_11 = arith.constant 0 : index
      %14 = vector.load %arg7[%c0_10, %c0_11] : memref<16x96xf32, #tpu.memory_space<vmem>>, vector<16x96xf32>
      %c0_12 = arith.constant 0 : index
      %c0_13 = arith.constant 0 : index
      %15 = vector.load %arg5[%c0_12, %c0_13] : memref<1x96xf32, #tpu.memory_space<vmem>>, vector<1x96xf32>
      %16 = vector.broadcast %15 : vector<1x96xf32> to vector<16x96xf32>
      %17 = arith.addf %14, %16 : vector<16x96xf32>
      %c0_14 = arith.constant 0 : index
      %c0_15 = arith.constant 0 : index
      %18 = vector.load %arg6[%c0_14, %c0_15] : memref<16x96xf32, #tpu.memory_space<vmem>>, vector<16x96xf32>
      tpu.vector_store %arg6[%c0_14, %c0_15], %17 {strides = array<i32>} : memref<16x96xf32, #tpu.memory_space<vmem>>, vector<16x96xf32>,
    } else {
    }
    return
  }
  func.func @transform_0(%arg0: i32, %arg1: i32, %arg2: i32) -> (i32, i32) {
    %c0_i32 = arith.constant 0 : i32
    return %arg0, %arg2 : i32, i32
  }
  func.func @transform_1(%arg0: i32, %arg1: i32, %arg2: i32) -> (i32, i32) {
    %c0_i32 = arith.constant 0 : i32
    return %arg2, %arg1 : i32, i32
  }
  func.func @transform_2(%arg0: i32, %arg1: i32, %arg2: i32) -> (i32, i32) {
    %c0_i32 = arith.constant 0 : i32
    %c0_i32_0 = arith.constant 0 : i32
    return %c0_i32, %arg1 : i32, i32
  }
  func.func @transform_3(%arg0: i32, %arg1: i32, %arg2: i32) -> (i32, i32) {
    %c0_i32 = arith.constant 0 : i32
    return %arg0, %arg1 : i32, i32
  }
}

</mosaic_0001>

<bundles_post_ra>
// kernel: tpu_custom_call.1
= control target key start
LH: loop header
LB: loop body
LE: loop exit
PB: predicated region body
PF: predicated region fallthrough
CT: control target
= control target key end

     0   :  { %8 = vsyncpa [#allocation4], 0  ;;  %s286_s0 = inlined_call_operand.hbm [shape: f32[16,32], index: 0, kind: input, shape index: {}]   ;;  %s287_s1 = inlined_call_operand.hbm [shape: f32[32,96], index: 1, kind: input, shape index: {}]   ;;  %s288_s2 = inlined_call_operand.vmem [shape: f32[1,96], index: 2, kind: input, shape index: {}]   ;;  %s289_s3 = inlined_call_operand.hbm [shape: f32[16,96], index: 3, kind: output, shape index: {}]  }
   0x1   :  { %9 = vsyncpa [#allocation7], 0 }
   0x2   :  { %10 = vsyncpa [#allocation5], 0  ;;  %s232_s12 = smov [#allocation3]  }
   0x3   :  { %s16_s13 = sshll.u32 %s232_s12, 4  ;;  %s17_s13 = int_to_ptr.vmem [resolvable:$true] %s16_s13 }
   0x4   :  { %s174_s14 = scalar_lea.vmem %s17_s13, 256  ;;  %p179_p1 = scmp.lt.s32.totalorder %s17_s13, %s17_s13 }
   0x5   :  { %p175_p0 = scmp.ne.s32.totalorder %s17_s13, %s174_s14  ;;  %p180_p2 = scmp.lt.s32.totalorder %s174_s14, %s174_s14 }
   0x7   :  { %p181_p3 = por %p180_p2, %p179_p1 }
   0x9   :  { %p182_p4 = pnand %p181_p3, %p175_p0 }
   0xb   :  { %185 = shalt.err (!%p182_p4)
}
   0xc   :  { %s233_s15 = smov 128   ;;  %s234_s16 = smov 8  }
   0xd   :  { %22 = dma.hbm_to_vmem [thread:$0]  %s286_s0, 256, %s17_s13, [#allocation4], %s233_s15, %s233_s15, %s234_s16  }
   0xe   :  { %s235_s19 = smov [#allocation6]  }
   0xf   :  { %s28_s20 = sshll.u32 %s235_s19, 4  ;;  %s29_s20 = int_to_ptr.vmem [resolvable:$true] %s28_s20 }
  0x10   :  { %s194_s21 = scalar_lea.vmem %s29_s20, 512  ;;  %p199_p6 = scmp.lt.s32.totalorder %s29_s20, %s29_s20 }
  0x11   :  { %p195_p5 = scmp.ne.s32.totalorder %s29_s20, %s194_s21  ;;  %p200_p7 = scmp.lt.s32.totalorder %s194_s21, %s194_s21 }
  0x13   :  { %p201_p8 = por %p200_p7, %p199_p6 }
  0x15   :  { %p202_p9 = pnand %p201_p8, %p195_p5 }
  0x17   :  { %205 = shalt.err (!%p202_p9)
}
  0x18   :  { %34 = dma.hbm_to_vmem [thread:$0]  %s287_s1, 512, %s29_s20, [#allocation7], %s233_s15, %s233_s15, %s234_s16  }
  0x19   :  { %226 = dma.done.wait [#allocation4], 256  }
  0x1a   :  { %227 = vsyncadd [#allocation4], 4294967040 }
  0x1b   :  { %228 = dma.done.wait [#allocation7], 512  }
  0x1c   :  { %229 = vsyncadd [#allocation7], 4294966784  ;;  %vm48_vm0 = vcmask 785408   ;;  %v236_v0 = vmov 0.0   ;;  %vm237_vm1 = vmmov 0   ;;  %v58_v1 = vld [vmem:[#allocation6 + $0x10] sm:$0xff] }
  0x1d   :  { %49 = vst.msk [vmem:[#allocation2] sm:$0xff] %vm48_vm0, %v236_v0  ;;  %50 = vst.msk [vmem:[#allocation2 + $0x8] sm:$0xff] %vm48_vm0, %v236_v0  ;;  %151 = vmatprep.subr.bf16.mxu0 %v236_v0  ;;  %155 = vmatprep.mubr.msk.bf16.mxu0 %vm237_vm1, %v236_v0  ;;  %v59_v2 = vld [vmem:[#allocation6 + $0x18] sm:$0xff]  ;;  %v56_v3 = vld [vmem:[#allocation6] sm:$0xff]  ;;  %vm62_vm2 = vcmask 261120   ;;  %s238_s24 = smov [#allocation8]  }
  0x1e   :  { %v61_v4 = vpack.c.bf16 %v59_v2, %v58_v1  ;;  %v57_v5 = vld [vmem:[#allocation6 + $0x8] sm:$0xff]  ;;  %v53_v7 = vld [vmem:[#allocation3] sm:$0xff]  ;;  %v54_v8 = vld [vmem:[#allocation3 + $0x8] sm:$0xff]  ;;  %s133_s25 = sshll.u32 %s238_s24, 4  ;;  %s134_s25 = int_to_ptr.vmem [resolvable:$true] %s133_s25 }
  0x1f   :  { %v60_v6 = vpack.c.bf16 %v57_v5, %v56_v3  ;;  %v55_v9 = vpack.c.bf16 %v54_v8, %v53_v7  ;;  %v147_v18 = vld [vmem:[%s288_s2] ss:$0 sm:$0xff]  ;;  %s206_s26 = scalar_lea.vmem %s134_s25, 256  ;;  %p211_p11 = scmp.lt.s32.totalorder %s134_s25, %s134_s25 }
  0x20   :  { %152 = vmatpush3.bf16.msra.mxu0 %v61_v4  ;;  %p207_p10 = scmp.ne.s32.totalorder %s134_s25, %s206_s26  ;;  %p212_p12 = scmp.lt.s32.totalorder %s206_s26, %s206_s26 }
  0x21   :  { %153 = vmatprep.subr.bf16.mxu0 %v236_v0 }
  0x22   :  { %p213_p13 = por %p212_p12, %p211_p11 }
  0x24   :  { %154 = vmatpush3.bf16.msra.mxu0 %v60_v6  ;;  %v51_v10 = vld [vmem:[#allocation2] sm:$0xff]  ;;  %v52_v14 = vld [vmem:[#allocation2 + $0x8] sm:$0xff]  ;;  %p214_p0 = pnand %p213_p13, %p207_p10 }
  0x27   :  { %156 = vmatmul.mubr.msk.bf16.vlgmr.msra.gmra.mxu0 %vm62_vm2, %v55_v9 }
  0xe7   :  { %v100_v11 = vpop.f32.mrf.mxu0 }
  0xe8   :  { %v107_v12 = vadd.f32 %v100_v11, %v51_v10 }
  0xe9   :  { %v157_v13 = vpop.f32.mrf.mxu0 }
  0xea   :  { %110 = vst.msk [vmem:[#allocation2] sm:$0xff] %vm48_vm0, %v107_v12 }
  0xeb   :  { %v103_v15 = vpop.f32.mrf.mxu0 }
  0xec   :  { %v108_v16 = vadd.f32 %v103_v15, %v52_v14 }
  0xed   :  { %v158_v17 = vpop.f32.mrf.mxu0 }
  0xee   :  { %111 = vst.msk [vmem:[#allocation2 + $0x8] sm:$0xff] %vm48_vm0, %v108_v16 }
  0xf1   :  { %v115_v19 = vld [vmem:[#allocation2] sm:$0xff] }
  0xf2   :  { %v124_v20 = vadd.f32 %v147_v18, %v115_v19 }
  0xf4   :  { %126 = vst.msk [vmem:[#allocation8] sm:$0xff] %vm48_vm0, %v124_v20 }
  0xf5   :  { %v116_v21 = vld [vmem:[#allocation2 + $0x8] sm:$0xff] }
  0xf6   :  { %v125_v22 = vadd.f32 %v147_v18, %v116_v21 }
  0xf8   :  { %127 = vst.msk [vmem:[#allocation8 + $0x8] sm:$0xff] %vm48_vm0, %v125_v22 }
  0xf9   :  { %217 = shalt.err (!%p214_p0)
}
  0xfa   :  { %139 = dma.vmem_to_hbm [thread:$0]  %s134_s25, 256, %s289_s3, [#allocation5], %s233_s15, %s233_s15, %s234_s16  }
  0xfb   :  { %230 = dma.done.wait [#allocation5], 256  }
  0xfc   :  { %231 = vsyncadd [#allocation5], 4294967040 }
  0xfd   :  { %143 = vsyncpa [#allocation4], 1 }
  0xfe   :  { %144 = vsyncpa [#allocation7], 1 }
  0xff   :  { %145 = vsyncpa [#allocation5], 1 }

</bundles_post_ra>
